<compile_context>
chip_gen: v5e
topology: v5e:2x2
jax: 0.10.0
libtpu: 0.0.40
codegen_flags: <defaults>
</compile_context>

<pallas_src>
import jax
import jax.numpy as jnp
from jax.experimental import pallas as pl
from jax.experimental.pallas import tpu as pltpu

_SQRT_HALF = 0.7071067811865476  # 1/sqrt(2)

# Abramowitz & Stegun 7.1.26 erf coefficients (max abs error ~1.5e-7).
_P = 0.3275911
_A1 = 0.254829592
_A2 = -0.284496736
_A3 = 1.421413741
_A4 = -1.453152027
_A5 = 1.061405429


def _erf_f32(z):
    """erf(z) via A&S 7.1.26; only uses abs/div/mul/add/exp/where (VPU + EUP)."""
    a = jnp.abs(z)
    t = 1.0 / (1.0 + _P * a)
    poly = t * (_A1 + t * (_A2 + t * (_A3 + t * (_A4 + t * _A5))))
    erf_abs = 1.0 - poly * jnp.exp(-(a * a))
    return jnp.where(z < 0.0, -erf_abs, erf_abs)


def _gelu_kernel(x_ref, o_ref):
    # Elementwise hot path on the whole VMEM tile: exact GELU
    #   gelu(x) = 0.5 * x * (1 + erf(x / sqrt(2)))
    x = x_ref[...]
    o_ref[...] = (0.5 * x * (1.0 + _erf_f32(x * _SQRT_HALF))).astype(o_ref.dtype)


def gelu_pallas(x: jax.Array) -> jax.Array:
    """torch.nn.GELU() (exact) for a 2-D float32 array, large lane-dense tiles."""
    assert x.ndim == 2, "module annotation is rank-2 ([-1, -1], float32)"
    M, N = x.shape
    itemsize = x.dtype.itemsize

    # ---- tile selection: lane-dense, ~4 MiB f32 per tile -------------------
    SUBLANE = 8
    TARGET_ELEMS = 1 << 20  # 1M f32 elements ~= 4 MiB per tile

    if N <= 2048:
        # 1-D grid over rows with the full lane extent (allowed even if N is
        # not a multiple of 128).
        tn = N
    else:
        # Wide, unmasked lane dimension (multiple of 128); edge block padded.
        tn = 2048

    rows = max(SUBLANE, (TARGET_ELEMS // tn) // SUBLANE * SUBLANE)
    # tm is a multiple of 8 unless it is the full extent M.
    tm = M if M <= rows else rows

    grid = (pl.cdiv(M, tm), pl.cdiv(N, tn))

    # Worst-case VMEM: 2x-buffered input + 2x-buffered output tiles
    # (<= 4 * 4 MiB = 16 MiB); 32 MiB fits every generation (v7x: 64 MiB phys).
    vmem_limit = 32 * 1024 * 1024

    cost = pl.CostEstimate(
        flops=12 * M * N,                      # polynomial + scaling per element
        transcendentals=M * N,                 # one exp per element (EUP)
        bytes_accessed=2 * M * N * itemsize,   # read x + write out
    )

    # TODO(synk): if the caller donates x, add input_output_aliases={0: 0} to
    # reuse the input buffer and halve peak HBM footprint.
    return pl.pallas_call(
        _gelu_kernel,
        out_shape=jax.ShapeDtypeStruct((M, N), x.dtype),
        grid_spec=pltpu.PrefetchScalarGridSpec(
            num_scalar_prefetch=0,
            grid=grid,
            in_specs=[pl.BlockSpec((tm, tn), lambda i, j: (i, j))],
            out_specs=pl.BlockSpec((tm, tn), lambda i, j: (i, j)),
        ),
        compiler_params=pltpu.CompilerParams(
            dimension_semantics=("parallel", "parallel"),
            vmem_limit_bytes=vmem_limit,
        ),
        cost_estimate=cost,
    )(x)


if __name__ == "__main__":
    key = jax.random.PRNGKey(0)
    # Small 2-D shape consistent with the ([-1, -1], float32) annotation.
    x = jax.random.normal(key, (16, 128), dtype=jnp.float32)

    out = jax.block_until_ready(gelu_pallas(x))

    # Reference: exact (erf-based) GELU, same as torch.nn.GELU() default.
    ref = jax.nn.gelu(x, approximate=False)
    assert out.shape == x.shape and out.dtype == x.dtype
    assert jnp.allclose(out, ref, atol=1e-5, rtol=1e-5), "mismatch vs reference GELU"

    print("KERNEL_OK")
</pallas_src>

<mosaic_0001>
module attributes {stable_mosaic.version = 11 : i64} {
  func.func @_gelu_kernel(%arg0: i32, %arg1: i32, %arg2: memref<16x128xf32, #tpu.memory_space<vmem>>, %arg3: memref<16x128xf32, #tpu.memory_space<vmem>>) attributes {dimension_semantics = [#tpu.dimension_semantics<parallel>, #tpu.dimension_semantics<parallel>], iteration_bounds = array<i64: 1, 1>, scalar_prefetch = 0 : i64, scratch_operands = 0 : i64, tpu.core_type = #tpu.core_type<tc>, window_params = [{transform_indices = @transform_0, window_bounds = array<i64: 16, 128>}, {transform_indices = @transform_1, window_bounds = array<i64: 16, 128>}]} {
    %c0 = arith.constant 0 : index
    %c0_0 = arith.constant 0 : index
    %0 = vector.load %arg2[%c0, %c0_0] : memref<16x128xf32, #tpu.memory_space<vmem>>, vector<16x128xf32>
    %cst = arith.constant 5.000000e-01 : f32
    %1 = vector.broadcast %cst : f32 to vector<16x128xf32>
    %2 = arith.mulf %1, %0 : vector<16x128xf32>
    %cst_1 = arith.constant 0.707106769 : f32
    %3 = vector.broadcast %cst_1 : f32 to vector<16x128xf32>
    %4 = arith.mulf %0, %3 : vector<16x128xf32>
    %5 = math.absf %4 : vector<16x128xf32>
    %cst_2 = arith.constant 0.327591091 : f32
    %6 = vector.broadcast %cst_2 : f32 to vector<16x128xf32>
    %7 = arith.mulf %6, %5 : vector<16x128xf32>
    %cst_3 = arith.constant 1.000000e+00 : f32
    %8 = vector.broadcast %cst_3 : f32 to vector<16x128xf32>
    %9 = arith.addf %8, %7 : vector<16x128xf32>
    %cst_4 = arith.constant 1.000000e+00 : f32
    %10 = vector.broadcast %cst_4 : f32 to vector<16x128xf32>
    %11 = arith.divf %10, %9 : vector<16x128xf32>
    %cst_5 = arith.constant 1.06140542 : f32
    %12 = vector.broadcast %cst_5 : f32 to vector<16x128xf32>
    %13 = arith.mulf %11, %12 : vector<16x128xf32>
    %cst_6 = arith.constant -1.45315206 : f32
    %14 = vector.broadcast %cst_6 : f32 to vector<16x128xf32>
    %15 = arith.addf %14, %13 : vector<16x128xf32>
    %16 = arith.mulf %11, %15 : vector<16x128xf32>
    %cst_7 = arith.constant 1.42141378 : f32
    %17 = vector.broadcast %cst_7 : f32 to vector<16x128xf32>
    %18 = arith.addf %17, %16 : vector<16x128xf32>
    %19 = arith.mulf %11, %18 : vector<16x128xf32>
    %cst_8 = arith.constant -0.284496725 : f32
    %20 = vector.broadcast %cst_8 : f32 to vector<16x128xf32>
    %21 = arith.addf %20, %19 : vector<16x128xf32>
    %22 = arith.mulf %11, %21 : vector<16x128xf32>
    %cst_9 = arith.constant 0.254829586 : f32
    %23 = vector.broadcast %cst_9 : f32 to vector<16x128xf32>
    %24 = arith.addf %23, %22 : vector<16x128xf32>
    %25 = arith.mulf %11, %24 : vector<16x128xf32>
    %26 = arith.mulf %5, %5 : vector<16x128xf32>
    %cst_10 = arith.constant 0.000000e+00 : f32
    %27 = vector.broadcast %cst_10 : f32 to vector<16x128xf32>
    %28 = arith.subf %27, %26 : vector<16x128xf32>
    %29 = math.exp %28 : vector<16x128xf32>
    %30 = arith.mulf %25, %29 : vector<16x128xf32>
    %cst_11 = arith.constant 1.000000e+00 : f32
    %31 = vector.broadcast %cst_11 : f32 to vector<16x128xf32>
    %32 = arith.subf %31, %30 : vector<16x128xf32>
    %cst_12 = arith.constant 0.000000e+00 : f32
    %33 = vector.broadcast %cst_12 : f32 to vector<16x128xf32>
    %34 = arith.cmpf olt, %4, %33 : vector<16x128xf32>
    %cst_13 = arith.constant 0.000000e+00 : f32
    %35 = vector.broadcast %cst_13 : f32 to vector<16x128xf32>
    %36 = arith.subf %35, %32 : vector<16x128xf32>
    %37 = arith.select %34, %36, %32 : vector<16x128xi1>, vector<16x128xf32>
    %cst_14 = arith.constant 1.000000e+00 : f32
    %38 = vector.broadcast %cst_14 : f32 to vector<16x128xf32>
    %39 = arith.addf %38, %37 : vector<16x128xf32>
    %40 = arith.mulf %2, %39 : vector<16x128xf32>
    %c0_15 = arith.constant 0 : index
    %c0_16 = arith.constant 0 : index
    %41 = vector.load %arg3[%c0_15, %c0_16] : memref<16x128xf32, #tpu.memory_space<vmem>>, vector<16x128xf32>
    tpu.vector_store %arg3[%c0_15, %c0_16], %40 {strides = array<i32>} : memref<16x128xf32, #tpu.memory_space<vmem>>, vector<16x128xf32>,
    return
  }
  func.func @transform_0(%arg0: i32, %arg1: i32) -> (i32, i32) {
    %c0_i32 = arith.constant 0 : i32
    return %arg0, %arg1 : i32, i32
  }
  func.func @transform_1(%arg0: i32, %arg1: i32) -> (i32, i32) {
    %c0_i32 = arith.constant 0 : i32
    return %arg0, %arg1 : i32, i32
  }
}

</mosaic_0001>

<bundles_post_ra>
// kernel: tpu_custom_call.1
= control target key start
LH: loop header
LB: loop body
LE: loop exit
PB: predicated region body
PF: predicated region fallthrough
CT: control target
= control target key end

     0   :  { %6 = vsyncpa [#allocation3], 0  ;;  %s234_s0 = inlined_call_operand.hbm [shape: f32[16,128], index: 0, kind: input, shape index: {}]   ;;  %s235_s1 = inlined_call_operand.hbm [shape: f32[16,128], index: 1, kind: output, shape index: {}]  }
   0x1   :  { %7 = vsyncpa [#allocation4], 0  ;;  %s12_s8 = sshll.u32 %s234_s0, 4  ;;  %s192_s9 = smov [#allocation2]   ;;  %s13_s8 = int_to_ptr.hbm [resolvable:$true] %s12_s8 }
   0x2   :  { %s14_s10 = sshll.u32 %s192_s9, 4  ;;  %s193_s11 = smov 128   ;;  %s15_s10 = int_to_ptr.vmem [resolvable:$true] %s14_s10 }
   0x3   :  { %s194_s12 = smov 8  }
   0x4   :  { %20 = dma.hbm_to_vmem [thread:$0]  %s13_s8, 256, %s15_s10, [#allocation3], %s193_s11, %s193_s11, %s194_s12  }
   0x5   :  { %188 = dma.done.wait [#allocation3], 256  }
   0x6   :  { %189 = vsyncadd [#allocation3], 4294967040  ;;  %v212_v0 = vld [vmem:[#allocation2] sm:$0xff]  ;;  %v214_v1 = vld [vmem:[#allocation2 + $0x8] sm:$0xff]  ;;  %s195_s0 = smov [#allocation5]   ;;  %s115_s16 = sshll.u32 %s235_s1, 4  ;;  %s116_s16 = int_to_ptr.hbm [resolvable:$true] %s115_s16 }
   0x7   :  { %v217_v2 = vmul.f32 0.70710677, %v212_v0  ;;  %v220_v3 = vmul.f32 0.70710677, %v214_v1  ;;  %v27_v61 = vmul.f32 0.5, %v212_v0  ;;  %s113_s13 = sshll.u32 %s195_s0, 4  ;;  %s114_s13 = int_to_ptr.vmem [resolvable:$true] %s113_s13 }
   0x9   :  { %v31_v4 = vand.u32 2147483647, %v217_v2  ;;  %v32_v5 = vand.u32 2147483647, %v220_v3  ;;  %vm97_vm8 = vcmp.lt.f32.partialorder %v217_v2, 0.0  ;;  %vm98_vm9 = vcmp.lt.f32.partialorder %v220_v3, 0.0 }
   0xb   :  { %v33_v6 = vmul.f32 0.3275911, %v31_v4  ;;  %v34_v7 = vmul.f32 0.3275911, %v32_v5  ;;  %v85_v25 = vmul.f32 %v31_v4, %v31_v4  ;;  %v86_v28 = vmul.f32 %v32_v5, %v32_v5 }
   0xc   :  { %v28_v4 = vmul.f32 0.5, %v214_v1 }
   0xd   :  { %v35_v8 = vadd.f32 1.0, %v33_v6  ;;  %v36_v9 = vadd.f32 1.0, %v34_v7  ;;  %v87_v33 = vsub.f32 0.0, %v85_v25  ;;  %v88_v36 = vsub.f32 0.0, %v86_v28 }
   0xf   :  { %132 = vrcp.f32 %v35_v8  ;;  %vm42_vm0 = vweird.f32 %v35_v8  ;;  %v48_v13 = vand.u32 2147483648, %v35_v8  ;;  %v46_v16 = vand.u32 2147483647, %v35_v8 }
  0x10   :  { %134 = vrcp.f32 %v36_v9  ;;  %v63_v17 = vand.u32 2147483648, %v36_v9  ;;  %vm57_vm2 = vweird.f32 %v36_v9  ;;  %v61_v19 = vand.u32 2147483647, %v36_v9 }
  0x11   :  { %v49_v21 = vor.u32 1.1754944e-38, %v48_v13  ;;  %vm47_vm5 = vcmp.eq.f32.partialorder %v46_v16, 8.507059e+37  ;;  %v89_v39 = vmul.f32 1.442695, %v87_v33  ;;  %v91_v42 = vmul.f32 1.442695, %v88_v36 }
  0x12   :  { %v64_v24 = vor.u32 1.1754944e-38, %v63_v17  ;;  %vm62_vm7 = vcmp.eq.f32.partialorder %v61_v19, 8.507059e+37 }
  0x13   :  { %136 = vpow2.f32 %v89_v39 }
  0x14   :  { %138 = vpow2.f32 %v91_v42 }
  0x15   :  { %v133_v10 = vpop.eup %132 }
  0x16   :  { %v135_v11 = vpop.eup %134  ;;  %v38_v12 = vmul.f32 %v133_v10, %v35_v8  ;;  %vm43_vm1 = vweird.f32 %v133_v10 }
  0x17   :  { %v53_v14 = vmul.f32 %v135_v11, %v36_v9  ;;  %vm58_vm3 = vweird.f32 %v135_v11  ;;  %vm44_vm4 = vmor %vm42_vm0, %vm43_vm1 }
  0x18   :  { %v39_v15 = vsub.f32 1.0, %v38_v12  ;;  %vm59_vm6 = vmor %vm57_vm2, %vm58_vm3 }
  0x19   :  { %v54_v18 = vsub.f32 1.0, %v53_v14  ;;  %v137_v51 = vpop.eup %136 }
  0x1a   :  { %v40_v20 = vmul.f32 %v133_v10, %v39_v15  ;;  %v139_v53 = vpop.eup %138 }
  0x1b   :  { %v55_v22 = vmul.f32 %v135_v11, %v54_v18 }
  0x1c   :  { %v41_v23 = vadd.f32 %v133_v10, %v40_v20 }
  0x1d   :  { %v56_v26 = vadd.f32 %v135_v11, %v55_v22 }
  0x1e   :  { %v45_v27 = vsel %vm44_vm4, %v133_v10, %v41_v23 }
  0x1f   :  { %v50_v29 = vsel %vm47_vm5, %v49_v21, %v45_v27  ;;  %v60_v30 = vsel %vm59_vm6, %v135_v11, %v56_v26 }
  0x20   :  { %v67_v31 = vmul.f32 1.0614054, %v50_v29  ;;  %v65_v32 = vsel %vm62_vm7, %v64_v24, %v60_v30 }
  0x21   :  { %v68_v34 = vmul.f32 1.0614054, %v65_v32 }
  0x22   :  { %v69_v35 = vadd.f32 -1.4531521, %v67_v31 }
  0x23   :  { %v70_v37 = vadd.f32 -1.4531521, %v68_v34 }
  0x24   :  { %v71_v38 = vmul.f32 %v69_v35, %v50_v29 }
  0x25   :  { %v72_v40 = vmul.f32 %v70_v37, %v65_v32 }
  0x26   :  { %v73_v41 = vadd.f32 1.4214138, %v71_v38 }
  0x27   :  { %v74_v43 = vadd.f32 1.4214138, %v72_v40 }
  0x28   :  { %v75_v44 = vmul.f32 %v73_v41, %v50_v29 }
  0x29   :  { %v76_v45 = vmul.f32 %v74_v43, %v65_v32 }
  0x2a   :  { %v77_v46 = vadd.f32 -0.28449672, %v75_v44 }
  0x2b   :  { %v78_v47 = vadd.f32 -0.28449672, %v76_v45 }
  0x2c   :  { %v79_v48 = vmul.f32 %v77_v46, %v50_v29 }
  0x2d   :  { %v80_v49 = vmul.f32 %v78_v47, %v65_v32 }
  0x2e   :  { %v81_v50 = vadd.f32 0.2548296, %v79_v48 }
  0x2f   :  { %v82_v52 = vadd.f32 0.2548296, %v80_v49 }
  0x30   :  { %v83_v54 = vmul.f32 %v81_v50, %v50_v29 }
  0x31   :  { %v84_v55 = vmul.f32 %v82_v52, %v65_v32 }
  0x32   :  { %v93_v56 = vmul.f32 %v137_v51, %v83_v54 }
  0x33   :  { %v94_v57 = vmul.f32 %v139_v53, %v84_v55 }
  0x34   :  { %v95_v58 = vsub.f32 1.0, %v93_v56 }
  0x35   :  { %v96_v59 = vsub.f32 1.0, %v94_v57 }
  0x36   :  { %v99_v60 = vsub.f32 0.0, %v95_v58 }
  0x37   :  { %v100_v62 = vsub.f32 0.0, %v96_v59 }
  0x38   :  { %v101_v63 = vsel %vm97_vm8, %v99_v60, %v95_v58 }
  0x39   :  { %v103_v5 = vadd.f32 1.0, %v101_v63  ;;  %v102_v6 = vsel %vm98_vm9, %v100_v62, %v96_v59 }
  0x3a   :  { %v104_v7 = vadd.f32 1.0, %v102_v6 }
  0x3b   :  { %v105_v2 = vmul.f32 %v103_v5, %v27_v61 }
  0x3c   :  { %v106_v8 = vmul.f32 %v104_v7, %v28_v4 }
  0x3d   :  { %107 = vst [vmem:[#allocation5] sm:$0xff] %v105_v2 }
  0x3e   :  { %108 = vst [vmem:[#allocation5 + $0x8] sm:$0xff] %v106_v8 }
  0x3f   :  { %121 = dma.vmem_to_hbm [thread:$0]  %s114_s13, 256, %s116_s16, [#allocation4], %s193_s11, %s193_s11, %s194_s12  }
  0x40   :  { %190 = dma.done.wait [#allocation4], 256  }
  0x41   :  { %191 = vsyncadd [#allocation4], 4294967040 }
  0x42   :  { %126 = vsyncpa [#allocation3], 1 }
  0x43   :  { %127 = vsyncpa [#allocation4], 1 }

</bundles_post_ra>
